<compile_context>
chip_gen: v7x
topology: tpu7x:2x2x1
jax: 0.10.0
libtpu: 0.0.40
codegen_flags: <defaults>
</compile_context>

<pallas_src>
import math

import jax
import jax.numpy as jnp
from jax import lax
from jax.experimental import pallas as pl
from jax.experimental.pallas import tpu as pltpu


def attention_pooling_kernel(x_ref, mask_ref, skw_ref, wvo_ref, o_ref):
    # x_ref:    (bb, N, E)  activations, input dtype (bf16/f32)
    # mask_ref: (bb, N)     key mask, f32, sequence on lanes
    # skw_ref:  (E, H)      = sum_d Wk[h,e,d]*q[h,0,d]/sqrt(D)  (scores = x @ skw)
    # wvo_ref:  (H, E, E)   = Wv[h] @ Wo[h]                      (pool-then-project)
    # o_ref:    (bb, E)
    bb, n, e = x_ref.shape
    nh = wvo_ref.shape[0]
    f32 = jnp.float32

    x3 = x_ref[...]                                               # (bb, N, E)

    # All-head scores with one MXU matmul contracting E; K is never materialized.
    s = jnp.dot(x3.reshape(bb * n, e), skw_ref[...],
                preferred_element_type=f32)                        # (bb*N, H)
    # Lane-dense layout for mask/softmax: sequence on lanes, heads on sublanes.
    s = jnp.swapaxes(s.reshape(bb, n, nh), 1, 2)                   # (bb, H, N)

    # Same mask arithmetic as the PyTorch module, in f32, once per batch block.
    m = mask_ref[...].astype(f32)[:, None, :]                      # (bb, 1, N)
    s = s * m + (-100000000.0) * (1.0 - m)

    # Numerically stable softmax over the lane (sequence) axis.  Normalization
    # is deferred until after pooling (fp reassociation only).
    s = s - jnp.max(s, axis=-1, keepdims=True)
    p = jnp.exp(s)                                                 # (bb, H, N)
    inv_l = pl.reciprocal(jnp.sum(p, axis=-1, keepdims=True),
                          approx=False)                            # (bb, H, 1), exact

    # Pool BEFORE projecting (linearity): xp[b,h,:] = sum_n p[b,h,n] * x[b,n,:].
    xp = lax.dot_general(p.astype(x3.dtype), x3,
                         dimension_numbers=(((2,), (1,)), ((0,), (0,))),
                         preferred_element_type=f32)               # (bb, H, E)
    xp = xp * inv_l                                                # softmax normalization

    # Fused V->O projection with per-head (E, E) weights; head sum accumulates.
    acc = jnp.zeros((bb, e), f32)
    for h in range(nh):
        acc = acc + jnp.dot(xp[:, h, :].astype(wvo_ref.dtype), wvo_ref[h],
                            preferred_element_type=f32)
    o_ref[...] = acc.astype(o_ref.dtype)


def _vmem_capacity_bytes():
    try:
        return int(pltpu.get_tpu_info().vmem_capacity_bytes)
    except Exception:
        return 64 * 1024 * 1024      # conservative default: v7x has 64 MiB / TensorCore


def _choose_block_b(batch, n, e, h, x_itemsize, w_itemsize):
    """VMEM-budgeted batch block size + explicit scoped-VMEM limit (bytes)."""
    capacity = _vmem_capacity_bytes()
    vmem_limit = int(capacity * 0.70)    # ~45 MiB on v7x (64 MiB), ~90 MiB on v5e/v6e (128 MiB)
    budget = int(vmem_limit * 0.85)      # headroom for Mosaic internal scratch

    weight_bytes = (e * h + h * e * e) * w_itemsize               # single-buffered
    per_row = (2 * n * e * x_itemsize                             # x block, double-buffered
               + n * 128 * 4                                      # score staging (H on lanes)
               + 2 * h * n * 4                                    # lane-dense scores + probs
               + 2 * h * e * 4                                    # pooled per-head features
               + 2 * n * 4                                        # mask block
               + 4 * e * 4)                                       # output block
    bb = max(1, (budget - weight_bytes) // per_row)
    bb = int(min(bb, batch))

    if bb >= batch:
        # Whole batch fits in one block.  Still split into aligned pieces when
        # possible so the "parallel" batch axis shards across v7x's two
        # TensorCores and the pipeline has >= 2 steps.
        for parts in (4, 3, 2):
            cand = batch // parts
            if cand >= 8 and cand % 8 == 0 and batch % cand == 0:
                return cand, vmem_limit
        return batch, vmem_limit
    if batch < 8:
        return batch, vmem_limit          # tiny batch: one full (aligned) block
    bb = max(8, (bb // 8) * 8)            # sublane-aligned blocks
    while bb > 8 and batch % bb != 0:     # prefer a divisor of B (no batch padding)
        bb -= 8
    return bb, vmem_limit


def _replicated_spec(shape):
    """Single-buffered BlockSpec for a grid-invariant (weight) operand."""
    index_map = lambda b: (0,) * len(shape)
    try:
        return pl.BlockSpec(shape, index_map, pipeline_mode=pl.Buffered(1))
    except Exception:                     # older jax without pipeline_mode support
        return pl.BlockSpec(shape, index_map)


def attention_pooling(x, w_k, w_v, w_o, q, mask=None, *, block_b=None):
    """x: [B, N, E], mask: [B, 1, N] or None.  Returns [B, E] in x.dtype."""
    B, N, E = x.shape
    H, _, D = w_k.shape
    f32 = jnp.float32

    # Mask passed 2-D with the sequence on lanes (no (bb, N, 1) lane padding).
    if mask is None:
        mask2 = jnp.ones((B, N), f32)
    else:
        mask2 = mask.reshape(B, N).astype(f32)

    # Head-fused weights, computed once in f32 and fed to the MXU in x.dtype.
    #   skw[e,h] = sum_d Wk[h,e,d] * q[h,0,d] / sqrt(D)
    #   wvo[h]   = Wv[h] @ Wo[h]   -> per-head (E, E)
    skw = (jnp.einsum('hed,hd->eh', w_k.astype(f32), q[:, 0, :].astype(f32))
           / math.sqrt(D)).astype(x.dtype)
    wvo = jnp.einsum('hed,hdf->hef', w_v.astype(f32),
                     w_o.astype(f32)).astype(x.dtype)
    # TODO(synk): for very large H*E*E, keep Wv/Wo separate (2*E*H*D weight bytes)
    # and apply them as H-batched dots instead of fusing into (H, E, E).

    x_itemsize = jnp.dtype(x.dtype).itemsize
    auto_bb, vmem_limit = _choose_block_b(B, N, E, H, x_itemsize, x_itemsize)
    bb = auto_bb if block_b is None else max(1, min(int(block_b), B))
    grid = pl.cdiv(B, bb)
    b_pad = grid * bb

    x_in, mask_in = x, mask2
    if b_pad != B:
        # Ragged tail (only when no aligned divisor of B fits the VMEM budget):
        # pad with zero rows / all-ones mask so the softmax stays finite.
        x_in = jnp.pad(x, ((0, b_pad - B), (0, 0), (0, 0)))
        mask_in = jnp.pad(mask2, ((0, b_pad - B), (0, 0)), constant_values=1.0)

    # TODO(synk): if N is not a multiple of 8, the in-kernel (bb,N,E)->(bb*N,E)
    # flatten may trigger a relayout; pad the sequence axis wrapper-side then.

    flops = (2 * b_pad * N * E * H          # scores
             + 2 * b_pad * N * H * E        # pooling
             + 2 * b_pad * H * E * E)       # output projection
    bytes_accessed = (x_in.size * x_itemsize + mask_in.size * 4
                      + skw.size * x_itemsize + wvo.size * x_itemsize
                      + b_pad * E * x_itemsize)
    cost = pl.CostEstimate(flops=int(flops), transcendentals=int(b_pad * N * H),
                           bytes_accessed=int(bytes_accessed))

    out = pl.pallas_call(
        attention_pooling_kernel,
        out_shape=jax.ShapeDtypeStruct((b_pad, E), x.dtype),
        grid=(grid,),
        in_specs=[
            pl.BlockSpec((bb, N, E), lambda b: (b, 0, 0)),   # x
            pl.BlockSpec((bb, N), lambda b: (b, 0)),         # mask
            _replicated_spec((E, H)),                        # skw (grid-invariant)
            _replicated_spec((H, E, E)),                     # wvo (grid-invariant)
        ],
        out_specs=pl.BlockSpec((bb, E), lambda b: (b, 0)),
        compiler_params=pltpu.CompilerParams(
            dimension_semantics=("parallel",),
            vmem_limit_bytes=int(vmem_limit)),
        cost_estimate=cost,
    )(x_in, mask_in, skw, wvo)
    return out[:B]


def reference(x, w_k, w_v, w_o, q, mask=None):
    """Plain-JAX replica of the PyTorch forward (dropout = Identity)."""
    D = w_k.shape[-1]
    v = jnp.einsum('blj,njd->bnld', x, w_v)
    k = jnp.einsum('blj,njd->bnld', x, w_k)
    score = jnp.einsum('nij,bnkj->bnik', q, k) / math.sqrt(D)
    if mask is not None:
        m = mask[:, None]
        score = score * m + (-100000000.0) * (1 - m)
    score = jax.nn.softmax(score, axis=-1)
    out = jnp.einsum('bnij,bnjk->bnik', score, v)
    out = jnp.einsum('bnlj,njk->blk', out, w_o)
    return out[:, 0]


def xavier_normal(key, shape):
    # Matches torch.nn.init.xavier_normal_ fan computation for >2D tensors.
    receptive = 1
    for s in shape[2:]:
        receptive *= s
    fan_in = shape[1] * receptive
    fan_out = shape[0] * receptive
    std = math.sqrt(2.0 / (fan_in + fan_out))
    return std * jax.random.normal(key, shape, dtype=jnp.float32)


def _run_case(key, B, N, E, H, D):
    kx, kk, kv, ko, kq, km = jax.random.split(key, 6)
    x = jax.random.normal(kx, (B, N, E), jnp.float32)
    w_k = xavier_normal(kk, (H, E, D))
    w_v = xavier_normal(kv, (H, E, D))
    w_o = xavier_normal(ko, (H, D, E))
    q = xavier_normal(kq, (H, 1, D))
    mask = (jax.random.uniform(km, (B, 1, N)) > 0.2).astype(jnp.float32)

    out = jax.block_until_ready(attention_pooling(x, w_k, w_v, w_o, q, mask))
    ref = reference(x, w_k, w_v, w_o, q, mask)
    assert out.shape == (B, E), out.shape
    assert jnp.allclose(out, ref, atol=1e-5, rtol=1e-5), (
        f"B={B}: max abs err = {jnp.max(jnp.abs(out - ref))}")


if __name__ == "__main__":
    key = jax.random.PRNGKey(0)
    k1, k2 = jax.random.split(key)
    _run_case(k1, B=2, N=8, E=32, H=4, D=16)    # single block (grid = 1)
    _run_case(k2, B=16, N=8, E=32, H=4, D=16)   # multi-block path (grid = 2)
    print("KERNEL_OK")
</pallas_src>

<mosaic_0001>
module attributes {stable_mosaic.version = 11 : i64} {
  func.func @attention_pooling_kernel(%arg0: i32, %arg1: memref<2x8x32xf32, #tpu.memory_space<vmem>>, %arg2: memref<2x8xf32, #tpu.memory_space<vmem>>, %arg3: memref<32x4xf32, #tpu.memory_space<vmem>>, %arg4: memref<4x32x32xf32, #tpu.memory_space<vmem>>, %arg5: memref<2x32xf32, #tpu.memory_space<vmem>>) attributes {dimension_semantics = [#tpu.dimension_semantics<parallel>], iteration_bounds = array<i64: 1>, scalar_prefetch = 0 : i64, scratch_operands = 0 : i64, tpu.core_type = #tpu.core_type<tc>, window_params = [{transform_indices = @transform_0, window_bounds = array<i64: 2, 8, 32>}, {transform_indices = @transform_1, window_bounds = array<i64: 2, 8>}, {pipeline_mode = #tpu.pipeline_mode<synchronous>, transform_indices = @transform_2, window_bounds = array<i64: 32, 4>}, {pipeline_mode = #tpu.pipeline_mode<synchronous>, transform_indices = @transform_3, window_bounds = array<i64: 4, 32, 32>}, {transform_indices = @transform_4, window_bounds = array<i64: 2, 32>}]} {
    %c0 = arith.constant 0 : index
    %c0_0 = arith.constant 0 : index
    %c0_1 = arith.constant 0 : index
    %0 = vector.load %arg1[%c0, %c0_0, %c0_1] : memref<2x8x32xf32, #tpu.memory_space<vmem>>, vector<2x8x32xf32>
    %1 = vector.shape_cast %0 : vector<2x8x32xf32> to vector<16x32xf32>
    %c0_2 = arith.constant 0 : index
    %c0_3 = arith.constant 0 : index
    %2 = vector.load %arg3[%c0_2, %c0_3] : memref<32x4xf32, #tpu.memory_space<vmem>>, vector<32x4xf32>
    %cst = arith.constant dense<0.000000e+00> : vector<16x4xf32>
    %3 = tpu.matmul %1, %2, %cst {dimension_numbers = #tpu.dot_dimension_numbers<[1], [0], [0], [1], [0, 0, 1, 1], [], []>} : vector<16x32xf32>, vector<32x4xf32>, vector<16x4xf32> -> vector<16x4xf32>
    %4 = vector.shape_cast %3 : vector<16x4xf32> to vector<2x8x4xf32>
    %5 = tpu.transpose %4, [0, 2, 1] : vector<2x8x4xf32> -> vector<2x4x8xf32>
    %c0_4 = arith.constant 0 : index
    %c0_5 = arith.constant 0 : index
    %6 = vector.load %arg2[%c0_4, %c0_5] : memref<2x8xf32, #tpu.memory_space<vmem>>, vector<2x8xf32>
    %7 = vector.shape_cast %6 : vector<2x8xf32> to vector<2x1x8xf32>
    %8 = vector.broadcast %7 : vector<2x1x8xf32> to vector<2x4x8xf32>
    %9 = arith.mulf %5, %8 : vector<2x4x8xf32>
    %cst_6 = arith.constant 1.000000e+00 : f32
    %10 = vector.broadcast %cst_6 : f32 to vector<2x1x8xf32>
    %11 = arith.subf %10, %7 : vector<2x1x8xf32>
    %cst_7 = arith.constant -1.000000e+08 : f32
    %12 = vector.broadcast %cst_7 : f32 to vector<2x1x8xf32>
    %13 = arith.mulf %12, %11 : vector<2x1x8xf32>
    %14 = vector.broadcast %13 : vector<2x1x8xf32> to vector<2x4x8xf32>
    %15 = arith.addf %9, %14 : vector<2x4x8xf32>
    %cst_8 = arith.constant dense<0xFF800000> : vector<2x4xf32>
    %16 = vector.multi_reduction <maximumf>, %15, %cst_8 [2] : vector<2x4x8xf32> to vector<2x4xf32>
    %17 = vector.shape_cast %16 : vector<2x4xf32> to vector<2x4x1xf32>
    %18 = vector.broadcast %17 : vector<2x4x1xf32> to vector<2x4x8xf32>
    %19 = arith.subf %15, %18 : vector<2x4x8xf32>
    %20 = math.exp %19 : vector<2x4x8xf32>
    %cst_9 = arith.constant dense<0.000000e+00> : vector<2x4xf32>
    %21 = vector.multi_reduction <add>, %20, %cst_9 [2] : vector<2x4x8xf32> to vector<2x4xf32>
    %22 = vector.shape_cast %21 : vector<2x4xf32> to vector<2x4x1xf32>
    %23 = tpu.reciprocal %22 : vector<2x4x1xf32> -> vector<2x4x1xf32>
    %cst_10 = arith.constant dense<0.000000e+00> : vector<2x4x32xf32>
    %24 = tpu.matmul %20, %0, %cst_10 {dimension_numbers = #tpu.dot_dimension_numbers<[2], [1], [1], [2], [0, 0, 0, 1, 1, 2], [0], [0]>} : vector<2x4x8xf32>, vector<2x8x32xf32>, vector<2x4x32xf32> -> vector<2x4x32xf32>
    %25 = vector.broadcast %23 : vector<2x4x1xf32> to vector<2x4x32xf32>
    %26 = arith.mulf %24, %25 : vector<2x4x32xf32>
    %cst_11 = arith.constant 0.000000e+00 : f32
    %27 = vector.broadcast %cst_11 : f32 to vector<2x32xf32>
    %28 = vector.extract_strided_slice %26 {offsets = [0, 0, 0], sizes = [2, 1, 32], strides = [1, 1, 1]} : vector<2x4x32xf32> to vector<2x1x32xf32>
    %29 = vector.shape_cast %28 : vector<2x1x32xf32> to vector<2x32xf32>
    %c0_12 = arith.constant 0 : index
    %c0_13 = arith.constant 0 : index
    %c0_14 = arith.constant 0 : index
    %30 = vector.load %arg4[%c0_12, %c0_13, %c0_14] : memref<4x32x32xf32, #tpu.memory_space<vmem>>, vector<1x32x32xf32>
    %31 = vector.shape_cast %30 : vector<1x32x32xf32> to vector<32x32xf32>
    %cst_15 = arith.constant dense<0.000000e+00> : vector<2x32xf32>
    %32 = tpu.matmul %29, %31, %cst_15 {dimension_numbers = #tpu.dot_dimension_numbers<[1], [0], [0], [1], [0, 0, 1, 1], [], []>} : vector<2x32xf32>, vector<32x32xf32>, vector<2x32xf32> -> vector<2x32xf32>
    %33 = arith.addf %27, %32 : vector<2x32xf32>
    %34 = vector.extract_strided_slice %26 {offsets = [0, 1, 0], sizes = [2, 1, 32], strides = [1, 1, 1]} : vector<2x4x32xf32> to vector<2x1x32xf32>
    %35 = vector.shape_cast %34 : vector<2x1x32xf32> to vector<2x32xf32>
    %c1 = arith.constant 1 : index
    %c0_16 = arith.constant 0 : index
    %c0_17 = arith.constant 0 : index
    %36 = vector.load %arg4[%c1, %c0_16, %c0_17] : memref<4x32x32xf32, #tpu.memory_space<vmem>>, vector<1x32x32xf32>
    %37 = vector.shape_cast %36 : vector<1x32x32xf32> to vector<32x32xf32>
    %cst_18 = arith.constant dense<0.000000e+00> : vector<2x32xf32>
    %38 = tpu.matmul %35, %37, %cst_18 {dimension_numbers = #tpu.dot_dimension_numbers<[1], [0], [0], [1], [0, 0, 1, 1], [], []>} : vector<2x32xf32>, vector<32x32xf32>, vector<2x32xf32> -> vector<2x32xf32>
    %39 = arith.addf %33, %38 : vector<2x32xf32>
    %40 = vector.extract_strided_slice %26 {offsets = [0, 2, 0], sizes = [2, 1, 32], strides = [1, 1, 1]} : vector<2x4x32xf32> to vector<2x1x32xf32>
    %41 = vector.shape_cast %40 : vector<2x1x32xf32> to vector<2x32xf32>
    %c2 = arith.constant 2 : index
    %c0_19 = arith.constant 0 : index
    %c0_20 = arith.constant 0 : index
    %42 = vector.load %arg4[%c2, %c0_19, %c0_20] : memref<4x32x32xf32, #tpu.memory_space<vmem>>, vector<1x32x32xf32>
    %43 = vector.shape_cast %42 : vector<1x32x32xf32> to vector<32x32xf32>
    %cst_21 = arith.constant dense<0.000000e+00> : vector<2x32xf32>
    %44 = tpu.matmul %41, %43, %cst_21 {dimension_numbers = #tpu.dot_dimension_numbers<[1], [0], [0], [1], [0, 0, 1, 1], [], []>} : vector<2x32xf32>, vector<32x32xf32>, vector<2x32xf32> -> vector<2x32xf32>
    %45 = arith.addf %39, %44 : vector<2x32xf32>
    %46 = vector.extract_strided_slice %26 {offsets = [0, 3, 0], sizes = [2, 1, 32], strides = [1, 1, 1]} : vector<2x4x32xf32> to vector<2x1x32xf32>
    %47 = vector.shape_cast %46 : vector<2x1x32xf32> to vector<2x32xf32>
    %c3 = arith.constant 3 : index
    %c0_22 = arith.constant 0 : index
    %c0_23 = arith.constant 0 : index
    %48 = vector.load %arg4[%c3, %c0_22, %c0_23] : memref<4x32x32xf32, #tpu.memory_space<vmem>>, vector<1x32x32xf32>
    %49 = vector.shape_cast %48 : vector<1x32x32xf32> to vector<32x32xf32>
    %cst_24 = arith.constant dense<0.000000e+00> : vector<2x32xf32>
    %50 = tpu.matmul %47, %49, %cst_24 {dimension_numbers = #tpu.dot_dimension_numbers<[1], [0], [0], [1], [0, 0, 1, 1], [], []>} : vector<2x32xf32>, vector<32x32xf32>, vector<2x32xf32> -> vector<2x32xf32>
    %51 = arith.addf %45, %50 : vector<2x32xf32>
    %c0_25 = arith.constant 0 : index
    %c0_26 = arith.constant 0 : index
    %52 = vector.load %arg5[%c0_25, %c0_26] : memref<2x32xf32, #tpu.memory_space<vmem>>, vector<2x32xf32>
    tpu.vector_store %arg5[%c0_25, %c0_26], %51 {strides = array<i32>} : memref<2x32xf32, #tpu.memory_space<vmem>>, vector<2x32xf32>,
    return
  }
  func.func @transform_0(%arg0: i32) -> (i32, i32, i32) {
    %c0_i32 = arith.constant 0 : i32
    %c0_i32_0 = arith.constant 0 : i32
    %c0_i32_1 = arith.constant 0 : i32
    return %arg0, %c0_i32, %c0_i32_0 : i32, i32, i32
  }
  func.func @transform_1(%arg0: i32) -> (i32, i32) {
    %c0_i32 = arith.constant 0 : i32
    %c0_i32_0 = arith.constant 0 : i32
    return %arg0, %c0_i32 : i32, i32
  }
  func.func @transform_2(%arg0: i32) -> (i32, i32) {
    %c0_i32 = arith.constant 0 : i32
    %c0_i32_0 = arith.constant 0 : i32
    %c0_i32_1 = arith.constant 0 : i32
    return %c0_i32, %c0_i32_0 : i32, i32
  }
  func.func @transform_3(%arg0: i32) -> (i32, i32, i32) {
    %c0_i32 = arith.constant 0 : i32
    %c0_i32_0 = arith.constant 0 : i32
    %c0_i32_1 = arith.constant 0 : i32
    %c0_i32_2 = arith.constant 0 : i32
    return %c0_i32, %c0_i32_0, %c0_i32_1 : i32, i32, i32
  }
  func.func @transform_4(%arg0: i32) -> (i32, i32) {
    %c0_i32 = arith.constant 0 : i32
    %c0_i32_0 = arith.constant 0 : i32
    return %arg0, %c0_i32 : i32, i32
  }
}

</mosaic_0001>

<bundles_post_ra>
// kernel: tpu_custom_call.1
= control target key start
LH: loop header
LB: loop body
LE: loop exit
PB: predicated region body
PF: predicated region fallthrough
CT: control target
= control target key end

     0   :  { %9 = vsyncpa [#allocation3], 0  ;;  %s1060_s0 = inlined_call_operand.vmem [shape: f32[2,8,32], index: 0, kind: input, shape index: {}]   ;;  %s1061_s1 = inlined_call_operand.vmem [shape: f32[2,8], index: 1, kind: input, shape index: {}]   ;;  %s1062_s2 = inlined_call_operand.vmem [shape: f32[32,4], index: 2, kind: input, shape index: {}]   ;;  %s1063_s3 = inlined_call_operand.hbm [shape: f32[4,32,32], index: 3, kind: input, shape index: {}]   ;;  %s1064_s4 = inlined_call_operand.hbm [shape: f32[2,32], index: 4, kind: output, shape index: {}]  }
   0x1   :  { %10 = vsyncpa [#allocation4], 0  ;;  %s954_s15 = smov [#allocation2]   ;;  %s906_s19 = scalar_lea.hbm %s1063_s3, 2048 }
   0x2   :  { %s22_s16 = sshll.u32 %s954_s15, 4  ;;  %p907_p0 = scmp.ne.s32.totalorder %s1063_s3, %s906_s19  ;;  %s23_s16 = int_to_ptr.vmem [resolvable:$true] %s22_s16 }
   0x3   :  { %p910_p1 = scmp.lt.u32.totalorder %s906_s19, %s1063_s3 }
   0x5   :  { %p912_p2 = pnand %p910_p1, %p907_p0 }
   0x7   :  { %915 = shalt.err (!%p912_p2)
}
   0x8   :  { %s916_s24 = scalar_lea.vmem %s23_s16, 2048  ;;  %p921_p4 = scmp.lt.s32.totalorder %s23_s16, %s23_s16 }
   0x9   :  { %p917_p3 = scmp.ne.s32.totalorder %s23_s16, %s916_s24  ;;  %p922_p5 = scmp.lt.s32.totalorder %s916_s24, %s916_s24 }
   0xb   :  { %p923_p6 = por %p922_p5, %p921_p4 }
   0xd   :  { %p924_p7 = pnand %p923_p6, %p917_p3 }
   0xf   :  { %927 = shalt.err (!%p924_p7)
}
  0x10   :  { %s955_s25 = smov 128   ;;  %s956_s26 = smov 8  }
  0x11   :  { %28 = dma.hbm_to_vmem [thread:$0]  %s1063_s3, 2048, %s23_s16, [#allocation3], %s955_s25, %s955_s25, %s956_s26  }
  0x12   :  { %950 = dma.done.wait [#allocation3], 2048  }
  0x13   :  { %951 = vsyncadd [#allocation3], 4294965248  ;;  %vm38_vm0 = vcmask 261120   ;;  %v34_v0 = vld [vmem:[%s1062_s2] sm:$0xff]  ;;  %v35_v1 = vld [vmem:[%s1062_s2 + $0x8] sm:$0xff]  ;;  %v197_v12 = vlaneseq  ;;  %vm240_vm1 = vcmask 60416  }
  0x14   :  { %v36_v2 = vld [vmem:[%s1062_s2 + $0x10] sm:$0xff]  ;;  %v853_v3 = vpack.c.bf16 %v35_v1, %v34_v0  ;;  %v37_v4 = vld [vmem:[%s1062_s2 + $0x18] sm:$0xff]  ;;  %v32_v5 = vld [vmem:[%s1060_s0] sm:$0xff]  ;;  %v957_v10 = vmov 1966171168   ;;  %v958_v37 = vmov 0.0  }
  0x15   :  { %v857_v6 = vpack.c.bf16 %v37_v4, %v36_v2  ;;  %796 = vmatprep.mubr.msk.f32.mxu0 %vm38_vm0, %v32_v5  ;;  %v33_v7 = vld [vmem:[%s1060_s0 + $0x8] sm:$0xff]  ;;  %v195_v11 = vunpack.c.l.s4 %v957_v10  ;;  %v198_v14 = vshrl.u32 %v197_v12, 7  ;;  %v751_v16 = vld.sshfl [vmem:[%s1061_s1] sm:$0x11 pattern:$0x75316420]  ;;  %799 = vmatprep.subr.mxu1 %v958_v37 }
  0x16   :  { %854 = vmatprep.subr.bf16.mxu0 %v853_v3  ;;  %v193_v18 = vcombine.high %v751_v16, %v751_v16  ;;  %vm959_vm2 = vmmov 0   ;;  %800 = vmatpush3.msra.mxu1 %v32_v5  ;;  %vm261_vm3 = vcmask 64512   ;;  %v415_v48 = vld [vmem:[#allocation2 + $0x20] sm:$0xff]  ;;  %v416_v49 = vld [vmem:[#allocation2 + $0x28] sm:$0xff]  ;;  %v960_v51 = vmov 0.0|0.0   ;;  %v417_v55 = vld [vmem:[#allocation2 + $0x30] sm:$0xff] }
  0x17   :  { %856 = vmatpush3.bf16.msra.mxu0 %v853_v3  ;;  %v196_v13 = vunpack.c.0.s8 %v195_v11  ;;  %v212_v21 = vsub.s32 0, %v198_v14  ;;  %801 = vmatprep.mubr.msk.f32.mxu1 %vm959_vm2, %v958_v37  ;;  %v862_v50 = vpack.c.bf16 %v416_v49, %v415_v48  ;;  %v571_v52 = vld [vmem:[#allocation2 + $0x40] sm:$0xff]  ;;  %v572_v53 = vld [vmem:[#allocation2 + $0x48] sm:$0xff]  ;;  %v418_v56 = vld [vmem:[#allocation2 + $0x38] sm:$0xff]  ;;  %vm422_vm4 = vcmask 1041409   ;;  %s961_s0 = smov [#allocation5]  }
  0x18   :  { %858 = vmatprep.subr.bf16.mxu0 %v857_v6  ;;  %804 = vmatprep.subr.mxu1 %v958_v37  ;;  %v874_v54 = vpack.c.bf16 %v572_v53, %v571_v52  ;;  %v865_v57 = vpack.c.bf16 %v418_v56, %v417_v55  ;;  %v573_v58 = vld [vmem:[#allocation2 + $0x50] sm:$0xff]  ;;  %v574_v59 = vld [vmem:[#allocation2 + $0x58] sm:$0xff]  ;;  %v410_v3 = vld [vmem:[#allocation2] sm:$0xff]  ;;  %s740_s1 = sshll.u32 %s961_s0, 4  ;;  %vm732_vm5 = vcmask 254976   ;;  %s741_s1 = int_to_ptr.vmem [resolvable:$true] %s740_s1 }
  0x19   :  { %v199_v15 = vsub.s32 %v196_v13, %v198_v14  ;;  %v877_v60 = vpack.c.bf16 %v574_v59, %v573_v58  ;;  %v411_v4 = vld [vmem:[#allocation2 + $0x8] sm:$0xff]  ;;  %v652_v5 = vld [vmem:[#allocation2 + $0x60] sm:$0xff]  ;;  %v412_v13 = vld [vmem:[#allocation2 + $0x10] sm:$0xff]  ;;  %s928_s15 = scalar_lea.vmem %s741_s1, 32  ;;  %p933_p9 = scmp.lt.s32.totalorder %s741_s1, %s741_s1 }
  0x1a   :  { %v868_v12 = vpack.c.bf16 %v411_v4, %v410_v3  ;;  %v413_v14 = vld [vmem:[#allocation2 + $0x18] sm:$0xff]  ;;  %p929_p8 = scmp.ne.s32.totalorder %s741_s1, %s928_s15  ;;  %p934_p10 = scmp.lt.s32.totalorder %s928_s15, %s928_s15 }
  0x1b   :  { %860 = vmatpush3.bf16.msra.mxu0 %v857_v6  ;;  %v200_v17 = vrot.slane %v751_v16, %v199_v15  ;;  %v207_v19 = vrot.slane %v193_v18, %v199_v15  ;;  %v653_v6 = vld [vmem:[#allocation2 + $0x68] sm:$0xff] }
  0x1c   :  { %861 = vmatprep.subr.bf16.mxu0 %v960_v51  ;;  %p935_p11 = por %p934_p10, %p933_p9 }
  0x1d   :  { %v222_v20 = vsub.f32 1.0, %v200_v17  ;;  %v223_v22 = vsub.f32 1.0, %v207_v19  ;;  %v213_v24 = vrot.slane %v200_v17, %v212_v21  ;;  %v217_v29 = vrot.slane %v207_v19, %v212_v21 }
  0x1e   :  { %797 = vmatmul.mubr.msk.f32.vlgmr.msra.gmra.mrb[0].mxu0 %vm38_vm0, %v33_v7  ;;  %v880_v17 = vpack.c.bf16 %v653_v6, %v652_v5  ;;  %p936_p12 = pnand %p935_p11, %p929_p8 }
  0x1f   :  { %v224_v23 = vmul.f32 -1e+08, %v222_v20  ;;  %v225_v26 = vmul.f32 -1e+08, %v223_v22  ;;  %817 = vmatprep.mubr.msk.f32.mxu0 %vm959_vm2, %v958_v37  ;;  %863 = vmatpush3.bf16.msra.mxu0 %v862_v50  ;;  %v871_v22 = vpack.c.bf16 %v413_v14, %v412_v13 }
  0x20   :  { %864 = vmatprep.subr.bf16.mxu0 %v960_v51 }
  0x21   :  { %v231_v25 = vrot.slane %v224_v23, %v212_v21  ;;  %v235_v31 = vrot.slane %v225_v26, %v212_v21  ;;  %v654_v23 = vld [vmem:[#allocation2 + $0x70] sm:$0xff] }
  0x23   :  { %866 = vmatpush3.bf16.msra.mxu0 %v865_v57 }
  0x24   :  { %867 = vmatprep.subr.bf16.mxu0 %v960_v51 }
  0xf1   :  { %v798_v8 = vpop.f32.mrb[0].mxu0 }
  0xf2   :  { %v111_v9 = vpop.f32.mrb[1].mxu0 }
  0xf3   :  { %120 = vxpose.xlu0.b32.start.end [1/1] (short) (narrow) %v111_v9, 8 }
  0xf7   :  { %152 = vxpose.xlu0.b32.start.end [1/1] (short) (narrow) %v798_v8, 8 }
 0x173   :  { %v136_v27 = vpop.trf.xlu0 }
 0x174   :  { %v220_v28 = vmul.f32 %v213_v24, %v136_v27  ;;  %v655_v24 = vld [vmem:[#allocation2 + $0x78] sm:$0xff] }
 0x176   :  { %v238_v30 = vadd.f32 %v231_v25, %v220_v28  ;;  %v883_v28 = vpack.c.bf16 %v655_v24, %v654_v23 }
 0x177   :  { %v168_v32 = vpop.trf.xlu0 }
 0x178   :  { %v221_v33 = vmul.f32 %v217_v29, %v168_v32  ;;  %v241_v34 = vsel %vm240_vm1, %v238_v30, -inf }
 0x179   :  { %242 = vmax.xlane.f32.xlu1 %v241_v34 }
 0x17a   :  { %v239_v35 = vadd.f32 %v235_v31, %v221_v33 }
 0x17c   :  { %v244_v36 = vsel %vm240_vm1, %v239_v35, -inf }
 0x17d   :  { %245 = vmax.xlane.f32.xlu1 %v244_v36 }
 0x206   :  { %v243_v38 = vpop.xlane.xlu1 %242 }
 0x207   :  { %v247_v39 = vsub.f32 %v238_v30, %v243_v38 }
 0x209   :  { %v249_v40 = vmul.f32 1.442695, %v247_v39 }
 0x20a   :  { %v246_v41 = vpop.xlane.xlu1 %245 }
 0x20b   :  { %898 = vpow2.f32 %v249_v40  ;;  %v248_v42 = vsub.f32 %v239_v35, %v246_v41 }
 0x20d   :  { %v251_v43 = vmul.f32 1.442695, %v248_v42 }
 0x20f   :  { %900 = vpow2.f32 %v251_v43 }
 0x215   :  { %v899_v44 = vpop.eup %898 }
 0x216   :  { %802 = vmatmul.mubr.msk.f32.vlgmr.msra.gmra.mrb[0].mxu1 %vm261_vm3, %v899_v44  ;;  %v253_v45 = vsel %vm240_vm1, %v899_v44, 0.0 }
 0x217   :  { %805 = vmatpush3.msra.mxu1 %v33_v7  ;;  %254 = vadd.xlane.f32.xlu0 %v253_v45 }
 0x218   :  { %806 = vmatprep.mubr.msk.f32.mxu1 %vm959_vm2, %v958_v37  ;;  %873 = vmatprep.subr.bf16.mxu1 %v960_v51 }
 0x219   :  { %v901_v46 = vpop.eup %900 }
 0x21a   :  { %807 = vmatmul.mubr.msk.f32.vlgmr.msra.gmra.mrb[2].mxu1 %vm261_vm3, %v901_v46  ;;  %v256_v47 = vsel %vm240_vm1, %v901_v46, 0.0 }
 0x21b   :  { %257 = vadd.xlane.f32.xlu1 %v256_v47  ;;  %839 = vmatprep.mubr.msk.f32.mxu1 %vm959_vm2, %v958_v37 }
 0x21c   :  { %875 = vmatpush3.bf16.msra.mxu1 %v874_v54 }
 0x21d   :  { %876 = vmatprep.subr.bf16.mxu1 %v960_v51 }
 0x220   :  { %878 = vmatpush3.bf16.msra.mxu1 %v877_v60 }
 0x221   :  { %879 = vmatprep.subr.bf16.mxu1 %v960_v51 }
 0x2a4   :  { %v255_v61 = vpop.xlane.xlu0 %254 }
 0x2a5   :  { %902 = vrcp.f32 %v255_v61 }
 0x2a8   :  { %v258_v62 = vpop.xlane.xlu1 %257 }
 0x2a9   :  { %904 = vrcp.f32 %v258_v62 }
 0x2af   :  { %v903_v63 = vpop.eup %902 }
 0x2b3   :  { %v905_v7 = vpop.eup %904 }
 0x2e9   :  { %v331_v0 = vpop.f32.mrb[0].mxu1 }
 0x2ea   :  { %v408_v1 = vmul.f32 %v903_v63, %v331_v0  ;;  %v803_v2 = vpop.f32.mrb[1].mxu1 }
 0x2ec   :  { %v421_v9 = vrot.slane %v408_v1, 1  ;;  %v575_v15 = vrot.slane %v408_v1, 2  ;;  %v656_v16 = vrot.slane %v408_v1, 3 }
 0x2ed   :  { %v404_v8 = vpop.f32.mrb[2].mxu1 }
 0x2ee   :  { %v409_v10 = vmul.f32 %v905_v7, %v404_v8  ;;  %v808_v11 = vpop.f32.mrb[3].mxu1 }
 0x2f0   :  { %v496_v18 = vrot.slane %v409_v10, 7  ;;  %v576_v19 = vrot.slane %v409_v10, 1  ;;  %v657_v20 = vrot.slane %v409_v10, 2  ;;  %v423_v21 = vsel %vm422_vm4, %v409_v10, %v421_v9 }
 0x2f1   :  { %818 = vmatmul.mubr.msk.f32.vlgmr.msra.gmra.mrb[2].mxu0 %vm38_vm0, %v423_v21 }
 0x2f2   :  { %869 = vmatpush3.bf16.msra.mxu0 %v868_v12  ;;  %v577_v25 = vsel %vm422_vm4, %v576_v19, %v575_v15  ;;  %828 = vmatprep.mubr.msk.f32.mxu0 %vm959_vm2, %v958_v37  ;;  %v497_v26 = vsel %vm422_vm4, %v496_v18, %v408_v1  ;;  %v658_v27 = vsel %vm422_vm4, %v657_v20, %v656_v16 }
 0x2f3   :  { %840 = vmatmul.mubr.msk.f32.vlgmr.msra.gmra.mrb[4].mxu1 %vm38_vm0, %v577_v25  ;;  %870 = vmatprep.subr.bf16.mxu0 %v960_v51 }
 0x2f4   :  { %881 = vmatpush3.bf16.msra.mxu1 %v880_v17  ;;  %850 = vmatprep.mubr.msk.f32.mxu1 %vm959_vm2, %v958_v37 }
 0x2f5   :  { %882 = vmatprep.subr.bf16.mxu1 %v960_v51 }
 0x2f6   :  { %872 = vmatpush3.bf16.msra.mxu0 %v871_v22 }
 0x2f8   :  { %884 = vmatpush3.bf16.msra.mxu1 %v883_v28 }
 0x2f9   :  { %829 = vmatmul.mubr.msk.f32.vlgmr.msra.gmra.mrb[2].mxu0 %vm38_vm0, %v497_v26 }
 0x2fb   :  { %851 = vmatmul.mubr.msk.f32.vlgmr.msra.gmra.mrb[4].mxu1 %vm38_vm0, %v658_v27 }
 0x3cc   :  { %v566_v29 = vpop.f32.mrb[2].mxu0 }
 0x3cd   :  { %v830_v30 = vpop.f32.mrb[3].mxu0 }
 0x3ce   :  { %v727_v31 = vpop.f32.mrb[4].mxu1 }
 0x3cf   :  { %v885_v32 = vadd.f32 %v727_v31, %v566_v29  ;;  %v852_v33 = vpop.f32.mrb[5].mxu1 }
 0x3d1   :  { %733 = vst.msk [vmem:[#allocation5] sm:$0x3] %vm732_vm5, %v885_v32 }
 0x3d2   :  { %939 = shalt.err (!%p936_p12)
}
 0x3d3   :  { %s940_s18 = scalar_lea.hbm %s1064_s4, 32 }
 0x3d4   :  { %p941_p13 = scmp.ne.s32.totalorder %s1064_s4, %s940_s18  ;;  %p944_p0 = scmp.lt.u32.totalorder %s940_s18, %s1064_s4 }
 0x3d6   :  { %p946_p1 = pnand %p944_p0, %p941_p13 }
 0x3d8   :  { %949 = shalt.err (!%p946_p1)
}
 0x3d9   :  { %743 = dma.vmem_to_hbm [thread:$0]  %s741_s1, 32, %s1064_s4, [#allocation4]  }
 0x3da   :  { %952 = dma.done.wait [#allocation4], 32  }
 0x3db   :  { %953 = vsyncadd [#allocation4], 4294967264 }
 0x3dc   :  { %747 = vsyncpa [#allocation3], 1 }
 0x3dd   :  { %748 = vsyncpa [#allocation4], 1 }

</bundles_post_ra>
